<compile_context>
chip_gen: v5e
topology: v5e:2x2
jax: 0.10.0
libtpu: 0.0.40
codegen_flags: <defaults>
</compile_context>

<pallas_src>
import jax
import jax.numpy as jnp
from jax.experimental import pallas as pl
from jax.experimental.pallas import tpu as pltpu

_SUB = 8      # f32 sublane tile
_LANE = 128   # lane tile


def _ceil_to(x, m):
    return -(-x // m) * m


def _build_rgcn_kernel(num_rel, n_nodes, layer_plan):
    """layer_plan: list of (fin, fout, w_row_off, b_row_off); all static Python ints."""
    R, N = num_rel, n_nodes

    def kernel(at_ref, xt_ref, wb_ref, out_ref, mscr):
        at = at_ref[...]          # (N, R*N)   aT[s, r*N + d] = Â_r[d, s]
        ht = xt_ref[...]          # (F0, N)    transposed activations

        for (fin, fout, w_off, b_off) in layer_plan:
            # --- MXU push 1: aggregate over src nodes for ALL relations at once ---
            mt = jnp.dot(ht, at, preferred_element_type=jnp.float32)    # (fin, R*N)

            # Relayout (fin, R*N) -> (R*fin, N): per-relation value slice (lane move,
            # unavoidable relation->feature merge) + sublane-aligned scratch stores.
            for r in range(R):
                mscr[r * fin:(r + 1) * fin, :] = mt[:, r * N:(r + 1) * N]
            m2t = mscr[0:R * fin, :]                                    # (R*fin, N)

            # --- MXU push 2: single contraction over the fused (relation, feature) dim ---
            wt = wb_ref[w_off:w_off + fout, 0:R * fin]                  # (fout, R*fin)
            bt = wb_ref[b_off:b_off + fout, 0:1]                        # (fout, 1) = sum_r b_r
            acct = jnp.dot(wt, m2t, preferred_element_type=jnp.float32)  # (fout, N)

            # HeteroRelu follows every HeteroGraphConv layer.
            ht = jnp.maximum(acct + bt, 0.0)

        out_ref[...] = ht.astype(out_ref.dtype)                         # (F_last, N)

    return kernel


def _rgcn_forward_impl(adj, norm_src, norm_dst, feat, params):
    """adj: (R,N,N) A[r,dst,src]; norm_src/norm_dst: (R,N,1); feat: (N,F0);
       params: list of (W: (R,Fin,Fout), b: (R,1,Fout)) per layer."""
    R, N, _ = adj.shape

    # Fold both degree norms into Â once (amortized across all layers); lay relations
    # along columns of the transposed operator aT so the kernel works feature-major.
    adj_hat = (norm_dst * adj * jnp.swapaxes(norm_src, 1, 2)).astype(jnp.float32)
    a_t = jnp.transpose(adj_hat, (2, 0, 1)).reshape(N, R * N)   # aT[s, r*N+d] = Â_r[d, s]
    feat_t = feat.astype(jnp.float32).T                         # (F0, N)

    # Pack ALL layer weights + pre-summed biases into one padded 2D slab (3 DMAs total).
    max_rfin = max(R * w.shape[1] for (w, _) in params)
    slab_w = _ceil_to(max_rfin, _LANE)

    blocks, layer_plan, row = [], [], 0
    for (w, b) in params:
        _, fin, fout = w.shape
        # wT[o, r*fin + k] = W_r[k, o]  (relation blocks on the contraction columns)
        w_t = jnp.transpose(w, (2, 0, 1)).reshape(fout, R * fin).astype(jnp.float32)
        b_t = jnp.sum(b, axis=0).astype(jnp.float32).T          # (fout, 1) = sum_r b_r

        w_rows = _ceil_to(fout, _SUB)
        b_rows = _ceil_to(fout, _SUB)
        w_pad = jnp.zeros((w_rows, slab_w), jnp.float32).at[:fout, :R * fin].set(w_t)
        b_pad = jnp.zeros((b_rows, slab_w), jnp.float32).at[:fout, :1].set(b_t)

        layer_plan.append((fin, fout, row, row + w_rows))
        blocks += [w_pad, b_pad]
        row += w_rows + b_rows

    wb_slab = jnp.concatenate(blocks, axis=0)                   # (rows, slab_w)

    f_last = layer_plan[-1][1]
    scr_rows = _ceil_to(max_rfin, _SUB)

    kernel = _build_rgcn_kernel(R, N, layer_plan)
    vmem = pl.BlockSpec(memory_space=pltpu.MemorySpace.VMEM)

    out_t = pl.pallas_call(
        kernel,
        out_shape=jax.ShapeDtypeStruct((f_last, N), jnp.float32),
        in_specs=[vmem, vmem, vmem],
        out_specs=vmem,
        scratch_shapes=[pltpu.VMEM((scr_rows, N), jnp.float32)],
    )(a_t, feat_t, wb_slab)

    return out_t.T      # (N, F_last); transpose fuses into the jitted graph


rgcn_forward = jax.jit(_rgcn_forward_impl)


def _reference(adj, norm_src, norm_dst, feat, params):
    """Pure-JAX reference with the original (unfused) per-relation DGL math."""
    h = feat
    for (w, b) in params:
        acc = jnp.zeros((h.shape[0], w.shape[2]), jnp.float32)
        for r in range(adj.shape[0]):
            msg = adj[r] @ (h * norm_src[r])
            acc = acc + (msg @ w[r]) * norm_dst[r] + b[r]
        h = jnp.maximum(acc, 0.0)
    return h


if __name__ == "__main__":
    key = jax.random.PRNGKey(0)

    # Module config: RGCN(layers=[8, 32, 16], rel_names=["r0", "r1", "r2"])
    layers = [8, 32, 16]
    R = 3          # number of relations (canonical edge types over one node type)
    N = 16         # number of nodes

    k_mask, k_ew, k_x, k_w = jax.random.split(key, 4)

    # Deterministic synthetic hetero-graph: per-relation adjacency + edge weights.
    mask = (jax.random.uniform(k_mask, (R, N, N)) < 0.3).astype(jnp.float32)
    edge_w = jax.random.uniform(k_ew, (R, N, N), minval=0.1, maxval=1.0)
    adj = mask * edge_w                                        # A[r, dst, src]

    # DGL GraphConv norm='both' uses UNWEIGHTED degrees, clamped to >= 1.
    out_deg = jnp.clip(mask.sum(axis=1), 1.0, None)            # (R, N) per src node
    in_deg = jnp.clip(mask.sum(axis=2), 1.0, None)             # (R, N) per dst node
    norm_src = (out_deg ** -0.5)[:, :, None]                   # (R, N, 1)
    norm_dst = (in_deg ** -0.5)[:, :, None]                    # (R, N, 1)

    # Node features (single node type "node").
    feat = jax.random.normal(k_x, (N, layers[0]), jnp.float32)

    # Deterministic parameter init, one (W, b) set per relation per layer.
    # (Biases made non-zero to exercise the bias path; DGL inits them to zero.)
    params = []
    for li, (fin, fout) in enumerate(zip(layers[:-1], layers[1:])):
        kw = jax.random.fold_in(k_w, li)
        scale = (6.0 / (fin + fout)) ** 0.5
        w = jax.random.uniform(kw, (R, fin, fout), minval=-scale, maxval=scale,
                               dtype=jnp.float32)
        b = jax.random.uniform(jax.random.fold_in(kw, 10_000), (R, 1, fout),
                               minval=-0.1, maxval=0.1, dtype=jnp.float32)
        params.append((w, b))

    out = rgcn_forward(adj, norm_src, norm_dst, feat, params)
    out = jax.block_until_ready(out)

    ref = _reference(adj, norm_src, norm_dst, feat, params)
    assert out.shape == (N, layers[-1])
    assert jnp.allclose(out, ref, atol=1e-4, rtol=1e-4)

    print("KERNEL_OK")
</pallas_src>

<mosaic_0001>
module attributes {stable_mosaic.version = 11 : i64} {
  func.func @kernel(%arg0: memref<16x48xf32, #tpu.memory_space<vmem>>, %arg1: memref<8x16xf32, #tpu.memory_space<vmem>>, %arg2: memref<96x128xf32, #tpu.memory_space<vmem>>, %arg3: memref<16x16xf32, #tpu.memory_space<vmem>>, %arg4: memref<96x16xf32, #tpu.memory_space<vmem>>) attributes {dimension_semantics = [], scalar_prefetch = 0 : i64, scratch_operands = 1 : i64, tpu.core_type = #tpu.core_type<tc>} {
    %c0 = arith.constant 0 : index
    %c0_0 = arith.constant 0 : index
    %0 = vector.load %arg0[%c0, %c0_0] : memref<16x48xf32, #tpu.memory_space<vmem>>, vector<16x48xf32>
    %c0_1 = arith.constant 0 : index
    %c0_2 = arith.constant 0 : index
    %1 = vector.load %arg1[%c0_1, %c0_2] : memref<8x16xf32, #tpu.memory_space<vmem>>, vector<8x16xf32>
    %cst = arith.constant dense<0.000000e+00> : vector<8x48xf32>
    %2 = tpu.matmul %1, %0, %cst {dimension_numbers = #tpu.dot_dimension_numbers<[1], [0], [0], [1], [0, 0, 1, 1], [], []>} : vector<8x16xf32>, vector<16x48xf32>, vector<8x48xf32> -> vector<8x48xf32>
    %3 = vector.extract_strided_slice %2 {offsets = [0, 0], sizes = [8, 16], strides = [1, 1]} : vector<8x48xf32> to vector<8x16xf32>
    %c0_3 = arith.constant 0 : index
    %c0_4 = arith.constant 0 : index
    %4 = vector.load %arg4[%c0_3, %c0_4] : memref<96x16xf32, #tpu.memory_space<vmem>>, vector<8x16xf32>
    tpu.vector_store %arg4[%c0_3, %c0_4], %3 {strides = array<i32>} : memref<96x16xf32, #tpu.memory_space<vmem>>, vector<8x16xf32>,
    %5 = vector.extract_strided_slice %2 {offsets = [0, 16], sizes = [8, 16], strides = [1, 1]} : vector<8x48xf32> to vector<8x16xf32>
    %c8 = arith.constant 8 : index
    %c0_5 = arith.constant 0 : index
    %6 = vector.load %arg4[%c8, %c0_5] : memref<96x16xf32, #tpu.memory_space<vmem>>, vector<8x16xf32>
    tpu.vector_store %arg4[%c8, %c0_5], %5 {strides = array<i32>} : memref<96x16xf32, #tpu.memory_space<vmem>>, vector<8x16xf32>,
    %7 = vector.extract_strided_slice %2 {offsets = [0, 32], sizes = [8, 16], strides = [1, 1]} : vector<8x48xf32> to vector<8x16xf32>
    %c16 = arith.constant 16 : index
    %c0_6 = arith.constant 0 : index
    %8 = vector.load %arg4[%c16, %c0_6] : memref<96x16xf32, #tpu.memory_space<vmem>>, vector<8x16xf32>
    tpu.vector_store %arg4[%c16, %c0_6], %7 {strides = array<i32>} : memref<96x16xf32, #tpu.memory_space<vmem>>, vector<8x16xf32>,
    %c0_7 = arith.constant 0 : index
    %c0_8 = arith.constant 0 : index
    %9 = vector.load %arg4[%c0_7, %c0_8] : memref<96x16xf32, #tpu.memory_space<vmem>>, vector<24x16xf32>
    %c0_9 = arith.constant 0 : index
    %c0_10 = arith.constant 0 : index
    %10 = vector.load %arg2[%c0_9, %c0_10] : memref<96x128xf32, #tpu.memory_space<vmem>>, vector<32x24xf32>
    %c32 = arith.constant 32 : index
    %c0_11 = arith.constant 0 : index
    %11 = vector.load %arg2[%c32, %c0_11] : memref<96x128xf32, #tpu.memory_space<vmem>>, vector<32x1xf32>
    %cst_12 = arith.constant dense<0.000000e+00> : vector<32x16xf32>
    %12 = tpu.matmul %10, %9, %cst_12 {dimension_numbers = #tpu.dot_dimension_numbers<[1], [0], [0], [1], [0, 0, 1, 1], [], []>} : vector<32x24xf32>, vector<24x16xf32>, vector<32x16xf32> -> vector<32x16xf32>
    %13 = vector.broadcast %11 : vector<32x1xf32> to vector<32x16xf32>
    %14 = arith.addf %12, %13 : vector<32x16xf32>
    %cst_13 = arith.constant 0.000000e+00 : f32
    %15 = vector.broadcast %cst_13 : f32 to vector<32x16xf32>
    %16 = arith.maximumf %14, %15 : vector<32x16xf32>
    %cst_14 = arith.constant dense<0.000000e+00> : vector<32x48xf32>
    %17 = tpu.matmul %16, %0, %cst_14 {dimension_numbers = #tpu.dot_dimension_numbers<[1], [0], [0], [1], [0, 0, 1, 1], [], []>} : vector<32x16xf32>, vector<16x48xf32>, vector<32x48xf32> -> vector<32x48xf32>
    %18 = vector.extract_strided_slice %17 {offsets = [0, 0], sizes = [32, 16], strides = [1, 1]} : vector<32x48xf32> to vector<32x16xf32>
    %c0_15 = arith.constant 0 : index
    %c0_16 = arith.constant 0 : index
    %19 = vector.load %arg4[%c0_15, %c0_16] : memref<96x16xf32, #tpu.memory_space<vmem>>, vector<32x16xf32>
    tpu.vector_store %arg4[%c0_15, %c0_16], %18 {strides = array<i32>} : memref<96x16xf32, #tpu.memory_space<vmem>>, vector<32x16xf32>,
    %20 = vector.extract_strided_slice %17 {offsets = [0, 16], sizes = [32, 16], strides = [1, 1]} : vector<32x48xf32> to vector<32x16xf32>
    %c32_17 = arith.constant 32 : index
    %c0_18 = arith.constant 0 : index
    %21 = vector.load %arg4[%c32_17, %c0_18] : memref<96x16xf32, #tpu.memory_space<vmem>>, vector<32x16xf32>
    tpu.vector_store %arg4[%c32_17, %c0_18], %20 {strides = array<i32>} : memref<96x16xf32, #tpu.memory_space<vmem>>, vector<32x16xf32>,
    %22 = vector.extract_strided_slice %17 {offsets = [0, 32], sizes = [32, 16], strides = [1, 1]} : vector<32x48xf32> to vector<32x16xf32>
    %c64 = arith.constant 64 : index
    %c0_19 = arith.constant 0 : index
    %23 = vector.load %arg4[%c64, %c0_19] : memref<96x16xf32, #tpu.memory_space<vmem>>, vector<32x16xf32>
    tpu.vector_store %arg4[%c64, %c0_19], %22 {strides = array<i32>} : memref<96x16xf32, #tpu.memory_space<vmem>>, vector<32x16xf32>,
    %c0_20 = arith.constant 0 : index
    %c0_21 = arith.constant 0 : index
    %24 = vector.load %arg4[%c0_20, %c0_21] : memref<96x16xf32, #tpu.memory_space<vmem>>, vector<96x16xf32>
    %c64_22 = arith.constant 64 : index
    %c0_23 = arith.constant 0 : index
    %25 = vector.load %arg2[%c64_22, %c0_23] : memref<96x128xf32, #tpu.memory_space<vmem>>, vector<16x96xf32>
    %c80 = arith.constant 80 : index
    %c0_24 = arith.constant 0 : index
    %26 = vector.load %arg2[%c80, %c0_24] : memref<96x128xf32, #tpu.memory_space<vmem>>, vector<16x1xf32>
    %cst_25 = arith.constant dense<0.000000e+00> : vector<16x16xf32>
    %27 = tpu.matmul %25, %24, %cst_25 {dimension_numbers = #tpu.dot_dimension_numbers<[1], [0], [0], [1], [0, 0, 1, 1], [], []>} : vector<16x96xf32>, vector<96x16xf32>, vector<16x16xf32> -> vector<16x16xf32>
    %28 = vector.broadcast %26 : vector<16x1xf32> to vector<16x16xf32>
    %29 = arith.addf %27, %28 : vector<16x16xf32>
    %cst_26 = arith.constant 0.000000e+00 : f32
    %30 = vector.broadcast %cst_26 : f32 to vector<16x16xf32>
    %31 = arith.maximumf %29, %30 : vector<16x16xf32>
    %c0_27 = arith.constant 0 : index
    %c0_28 = arith.constant 0 : index
    %32 = vector.load %arg3[%c0_27, %c0_28] : memref<16x16xf32, #tpu.memory_space<vmem>>, vector<16x16xf32>
    tpu.vector_store %arg3[%c0_27, %c0_28], %31 {strides = array<i32>} : memref<16x16xf32, #tpu.memory_space<vmem>>, vector<16x16xf32>,
    return
  }
}

</mosaic_0001>

<bundles_post_ra>
// kernel: _rgcn_forward_impl.1
= control target key start
LH: loop header
LB: loop body
LE: loop exit
PB: predicated region body
PF: predicated region fallthrough
CT: control target
= control target key end

     0   :  { %vm17_vm0 = vcmask 130048   ;;  %s302_s18 = smov 96   ;;  %s303_s19 = smov 112   ;;  %v304_v5 = vmov 0   ;;  %vm82_vm1 = vcmask 195584   ;;  %vm235_vm2 = vcmask 785408   ;;  %s408_s0 = inlined_call_operand.vmem [shape: f32[16,48], index: 0, kind: input, shape index: {}]   ;;  %s409_s1 = inlined_call_operand.vmem [shape: f32[8,16], index: 1, kind: input, shape index: {}]   ;;  %s410_s2 = inlined_call_operand.vmem [shape: f32[96,128], index: 2, kind: input, shape index: {}]   ;;  %s411_s3 = inlined_call_operand.vmem [shape: f32[16,16], index: 3, kind: output, shape index: {}]  }
   0x1   :  { %v15_v0 = vld [vmem:[%s408_s0 + $0x8] sm:$0xff]  ;;  %v14_v1 = vld [vmem:[%s408_s0] sm:$0xff]  ;;  %299 = vset.pattern.permute.xlu1 %v304_v5  ;;  %300 = vset.pattern.permute.xlu2 %v304_v5  ;;  %v60_v10 = vld [vmem:[%s410_s2 + $0x30] sm:$0xff] }
   0x2   :  { %35 = vmatpush.msra.mxu0 %v15_v0  ;;  %v16_v2 = vld [vmem:[%s409_s1] sm:$0xff]  ;;  %154 = vmatpush.msra.mxu2 %v15_v0  ;;  %v59_v6 = vld [vmem:[%s410_s2 + $0x28] sm:$0xff]  ;;  %v61_v14 = vld [vmem:[%s410_s2 + $0x38] sm:$0xff] }
   0x3   :  { %v58_v4 = vld [vmem:[%s410_s2 + $0x20] sm:$0xff]  ;;  %301 = vset.pattern.permute.xlu0 %v304_v5  ;;  %74 = vperm.xlu2 %300, %v60_v10   ;;  %v55_v15 = vld [vmem:[%s410_s2 + $0x8] sm:$0xff]  ;;  %v56_v16 = vld [vmem:[%s410_s2 + $0x10] sm:$0xff] }
   0x4   :  { %36 = vmatpush.msra.mxu0 %v14_v1  ;;  %155 = vmatpush.msra.mxu2 %v14_v1  ;;  %v54_v12 = vld [vmem:[%s410_s2] sm:$0xff]  ;;  %v57_v17 = vld [vmem:[%s410_s2 + $0x18] sm:$0xff]  ;;  %v223_v37 = vld [vmem:[%s410_s2 + $0x50] sm:$0xff] }
   0x5   :  { %273 = vmatmul.msk.f32.vlgmr.msra.gmra.mxu0 %vm17_vm0, %v16_v2  ;;  %64 = vperm.xlu1 %299, %v58_v4   ;;  %v224_v44 = vld [vmem:[%s410_s2 + $0x58] sm:$0xff]  ;;  %v221_v59 = vld [vmem:[%s410_s2 + $0x40] sm:$0xff]  ;;  %v222_v60 = vld [vmem:[%s410_s2 + $0x48] sm:$0xff] }
   0xb   :  { %79 = vperm.xlu2 %300, %v61_v14  }
   0xd   :  { %69 = vperm.xlu1 %299, %v59_v6  }
  0x5d   :  { %v75_v26 = vpop.permute.xlu2 %74 }
  0x65   :  { %v80_v30 = vpop.permute.xlu2 %79 }
  0x77   :  { %v65_v18 = vpop.permute.xlu1 %64 }
  0x7f   :  { %v70_v22 = vpop.permute.xlu1 %69 }
  0x82   :  { %v38_v3 = vpop.f32.mrf.mxu0 }
  0x83   :  { %41 = vst.msk [vmem:[#allocation2] sm:$0xff] %vm17_vm0, %v38_v3  ;;  %47 = vrot.lane.b32.xlu0 %v38_v3, %s302_s18 }
  0x8a   :  { %v51_v13 = vld [vmem:[#allocation2] sm:$0xff] }
  0x8b   :  { %43 = vrot.lane.b32.xlu0 %v38_v3, %s303_s19 }
  0xf5   :  { %v48_v7 = vpop.permute.xlu0 %47 }
  0xf6   :  { %50 = vst.msk [vmem:[#allocation2 + $0x10] sm:$0xff] %vm17_vm0, %v48_v7 }
  0xfd   :  { %v44_v8 = vpop.permute.xlu0 %43  ;;  %v53_v9 = vld [vmem:[#allocation2 + $0x10] sm:$0xff] }
  0xfe   :  { %46 = vst.msk [vmem:[#allocation2 + $0x8] sm:$0xff] %vm17_vm0, %v44_v8  ;;  %108 = vmatpush.msra.mxu1 %v53_v9 }
 0x105   :  { %v52_v11 = vld [vmem:[#allocation2 + $0x8] sm:$0xff] }
 0x106   :  { %109 = vmatpush.msra.mxu1 %v52_v11 }
 0x108   :  { %110 = vmatpush.msra.mxu1 %v51_v13 }
 0x109   :  { %274 = vmatmul.msk.f32.vlgmr.msra.gmra.mxu1 %vm82_vm1, %v54_v12 }
 0x111   :  { %275 = vmatmul.msk.f32.gmra.mxu1 %vm82_vm1, %v55_v15 }
 0x119   :  { %276 = vmatmul.msk.f32.gmra.mxu1 %vm82_vm1, %v56_v16 }
 0x121   :  { %277 = vmatmul.msk.f32.gmra.mxu1 %vm82_vm1, %v57_v17 }
 0x186   :  { %v112_v19 = vpop.f32.mrf.mxu1 }
 0x187   :  { %v113_v20 = vadd.f32 %v112_v19, %v65_v18 }
 0x189   :  { %v124_v21 = vmax.f32 %v113_v20, 0.0 }
 0x18b   :  { %278 = vmatmul.msk.f32.vlgmr.msra.gmra.mxu2 %vm17_vm0, %v124_v21 }
 0x18e   :  { %v115_v23 = vpop.f32.mrf.mxu1 }
 0x18f   :  { %v116_v24 = vadd.f32 %v115_v23, %v70_v22 }
 0x191   :  { %v125_v25 = vmax.f32 %v116_v24, 0.0 }
 0x193   :  { %279 = vmatmul.msk.f32.gmra.mxu2 %vm17_vm0, %v125_v25 }
 0x196   :  { %v118_v27 = vpop.f32.mrf.mxu1 }
 0x197   :  { %v119_v28 = vadd.f32 %v118_v27, %v75_v26 }
 0x199   :  { %v126_v29 = vmax.f32 %v119_v28, 0.0 }
 0x19b   :  { %280 = vmatmul.msk.f32.gmra.mxu2 %vm17_vm0, %v126_v29 }
 0x19e   :  { %v121_v31 = vpop.f32.mrf.mxu1 }
 0x19f   :  { %v122_v32 = vadd.f32 %v121_v31, %v80_v30 }
 0x1a1   :  { %v127_v33 = vmax.f32 %v122_v32, 0.0 }
 0x1a3   :  { %281 = vmatmul.msk.f32.gmra.mxu2 %vm17_vm0, %v127_v33 }
 0x20e   :  { %v157_v34 = vpop.f32.mrf.mxu2 }
 0x20f   :  { %169 = vst.msk [vmem:[#allocation2] sm:$0xff] %vm17_vm0, %v157_v34 }
 0x216   :  { %v160_v35 = vpop.f32.mrf.mxu2  ;;  %v209_v61 = vld [vmem:[#allocation2] sm:$0xff] }
 0x217   :  { %170 = vst.msk [vmem:[#allocation2 + $0x8] sm:$0xff] %vm17_vm0, %v160_v35  ;;  %195 = vrot.lane.b32.xlu2 %v160_v35, %s302_s18 }
 0x21e   :  { %v163_v36 = vpop.f32.mrf.mxu2  ;;  %v210_v58 = vld [vmem:[#allocation2 + $0x8] sm:$0xff] }
 0x21f   :  { %171 = vst.msk [vmem:[#allocation2 + $0x10] sm:$0xff] %vm17_vm0, %v163_v36  ;;  %181 = vrot.lane.b32.xlu2 %v163_v36, %s303_s19  ;;  %197 = vrot.lane.b32.xlu1 %v163_v36, %s302_s18 }
 0x226   :  { %v166_v38 = vpop.f32.mrf.mxu2  ;;  %v211_v57 = vld [vmem:[#allocation2 + $0x10] sm:$0xff] }
 0x227   :  { %172 = vst.msk [vmem:[#allocation2 + $0x18] sm:$0xff] %vm17_vm0, %v166_v38  ;;  %227 = vperm.xlu2 %300, %v223_v37   ;;  %183 = vrot.lane.b32.xlu1 %v166_v38, %s303_s19 }
 0x228   :  { %199 = vrot.lane.b32.xlu0 %v166_v38, %s302_s18 }
 0x22e   :  { %v212_v56 = vld [vmem:[#allocation2 + $0x18] sm:$0xff] }
 0x22f   :  { %177 = vrot.lane.b32.xlu1 %v157_v34, %s303_s19 }
 0x230   :  { %193 = vrot.lane.b32.xlu0 %v157_v34, %s302_s18 }
 0x238   :  { %179 = vrot.lane.b32.xlu0 %v160_v35, %s303_s19 }
 0x240   :  { %232 = vperm.xlu0 %301, %v224_v44  }
 0x271   :  { %v196_v39 = vpop.permute.xlu2 %195 }
 0x272   :  { %206 = vst.msk [vmem:[#allocation2 + $0x48] sm:$0xff] %vm17_vm0, %v196_v39 }
 0x279   :  { %v182_v40 = vpop.permute.xlu2 %181  ;;  %v218_v49 = vld [vmem:[#allocation2 + $0x48] sm:$0xff] }
 0x27a   :  { %191 = vst.msk [vmem:[#allocation2 + $0x30] sm:$0xff] %vm17_vm0, %v182_v40 }
 0x281   :  { %v215_v53 = vld [vmem:[#allocation2 + $0x30] sm:$0xff]  ;;  %v228_v62 = vpop.permute.xlu2 %227 }
 0x291   :  { %v198_v41 = vpop.permute.xlu1 %197 }
 0x292   :  { %207 = vst.msk [vmem:[#allocation2 + $0x50] sm:$0xff] %vm17_vm0, %v198_v41 }
 0x299   :  { %v184_v42 = vpop.permute.xlu1 %183  ;;  %v219_v48 = vld [vmem:[#allocation2 + $0x50] sm:$0xff] }
 0x29a   :  { %192 = vst.msk [vmem:[#allocation2 + $0x38] sm:$0xff] %vm17_vm0, %v184_v42  ;;  %v200_v43 = vpop.permute.xlu0 %199 }
 0x29b   :  { %208 = vst.msk [vmem:[#allocation2 + $0x58] sm:$0xff] %vm17_vm0, %v200_v43 }
 0x2a1   :  { %v178_v45 = vpop.permute.xlu1 %177  ;;  %v216_v52 = vld [vmem:[#allocation2 + $0x38] sm:$0xff] }
 0x2a2   :  { %189 = vst.msk [vmem:[#allocation2 + $0x20] sm:$0xff] %vm17_vm0, %v178_v45  ;;  %v194_v46 = vpop.permute.xlu0 %193  ;;  %v220_v47 = vld [vmem:[#allocation2 + $0x58] sm:$0xff] }
 0x2a3   :  { %205 = vst.msk [vmem:[#allocation2 + $0x40] sm:$0xff] %vm17_vm0, %v194_v46  ;;  %246 = vmatpush.msrb.mxu0 %v220_v47  ;;  %284 = vmatpush.msra.mxu3 %v220_v47 }
 0x2a5   :  { %247 = vmatpush.msrb.mxu0 %v219_v48  ;;  %285 = vmatpush.msra.mxu3 %v219_v48 }
 0x2a7   :  { %248 = vmatpush.msrb.mxu0 %v218_v49  ;;  %286 = vmatpush.msra.mxu3 %v218_v49 }
 0x2a9   :  { %v213_v55 = vld [vmem:[#allocation2 + $0x20] sm:$0xff] }
 0x2aa   :  { %v180_v50 = vpop.permute.xlu0 %179  ;;  %v217_v51 = vld [vmem:[#allocation2 + $0x40] sm:$0xff] }
 0x2ab   :  { %190 = vst.msk [vmem:[#allocation2 + $0x28] sm:$0xff] %vm17_vm0, %v180_v50  ;;  %249 = vmatpush.msrb.mxu0 %v217_v51  ;;  %287 = vmatpush.msra.mxu3 %v217_v51 }
 0x2ad   :  { %250 = vmatpush.msrb.mxu0 %v216_v52  ;;  %288 = vmatpush.msra.mxu3 %v216_v52 }
 0x2af   :  { %251 = vmatpush.msrb.mxu0 %v215_v53  ;;  %289 = vmatpush.msra.mxu3 %v215_v53 }
 0x2b2   :  { %v214_v54 = vld [vmem:[#allocation2 + $0x28] sm:$0xff]  ;;  %v233_v2 = vpop.permute.xlu0 %232 }
 0x2b3   :  { %252 = vmatpush.msrb.mxu0 %v214_v54  ;;  %290 = vmatpush.msra.mxu3 %v214_v54 }
 0x2b5   :  { %253 = vmatpush.msrb.mxu0 %v213_v55  ;;  %291 = vmatpush.msra.mxu3 %v213_v55 }
 0x2b7   :  { %254 = vmatpush.msrb.mxu0 %v212_v56  ;;  %292 = vmatpush.msra.mxu3 %v212_v56 }
 0x2b9   :  { %255 = vmatpush.msrb.mxu0 %v211_v57  ;;  %293 = vmatpush.msra.mxu3 %v211_v57 }
 0x2bb   :  { %256 = vmatpush.msrb.mxu0 %v210_v58  ;;  %294 = vmatpush.msra.mxu3 %v210_v58 }
 0x2bd   :  { %257 = vmatpush.msrb.mxu0 %v209_v61  ;;  %295 = vmatpush.msra.mxu3 %v209_v61 }
 0x2be   :  { %282 = vmatmul.msk.f32.vlgmr.msrb.gmra.mxu0 %vm235_vm2, %v221_v59  ;;  %283 = vmatmul.msk.f32.vlgmr.msra.gmra.mxu3 %vm235_vm2, %v222_v60 }
 0x33b   :  { %v259_v63 = vpop.f32.mrf.mxu0 }
 0x33c   :  { %v260_v0 = vadd.f32 %v259_v63, %v228_v62 }
 0x33e   :  { %v265_v1 = vmax.f32 %v260_v0, 0.0 }
 0x340   :  { %267 = vst.msk [vmem:[%s411_s3] sm:$0xff] %vm17_vm0, %v265_v1 }
 0x341   :  { %v262_v3 = vpop.f32.mrf.mxu3 }
 0x342   :  { %v263_v4 = vadd.f32 %v262_v3, %v233_v2 }
 0x344   :  { %v266_v5 = vmax.f32 %v263_v4, 0.0 }
 0x346   :  { %268 = vst.msk [vmem:[%s411_s3 + $0x8] sm:$0xff] %vm17_vm0, %v266_v5 }

</bundles_post_ra>
